<compile_context>
chip_gen: v5e
topology: v5e:2x2
jax: 0.10.0
libtpu: 0.0.40
codegen_flags: <defaults>
</compile_context>

<pallas_src>
import functools

import jax
import jax.numpy as jnp
from jax.experimental import pallas as pl
from jax.experimental.pallas import tpu as pltpu


def _cbam_channel_attn_kernel(x_ref, w1t_ref, w2t_ref, o_ref, *, inv_s):
    # x_ref  : (B_TILE, C, S) block (full C and S extents)
    # w1t_ref: (C, Cr)  (transpose of torch Linear1 weight (Cr, C))
    # w2t_ref: (Cr, C)  (transpose of torch Linear2 weight (C, Cr))
    x = x_ref[...]                                   # (B_TILE, C, S)
    bt = x.shape[0]
    xf = x.astype(jnp.float32)

    # Spatial max / mean (no masking needed: block covers exactly S).
    mx = jnp.max(xf, axis=-1)                        # (B_TILE, C)
    av = jnp.sum(xf, axis=-1) * inv_s                # (B_TILE, C)

    # Fused shared MLP over both pooled paths and all batch rows in the tile:
    # (2*B_TILE, C) -> (2*B_TILE, Cr) -> (2*B_TILE, C).
    pooled = jnp.concatenate([mx, av], axis=0)       # (2*B_TILE, C)
    h = jnp.dot(pooled, w1t_ref[...], preferred_element_type=jnp.float32)
    h = jnp.maximum(h, 0.0)                          # ReLU
    logits2 = jnp.dot(h, w2t_ref[...], preferred_element_type=jnp.float32)
    logits = logits2[:bt, :] + logits2[bt:, :]       # (B_TILE, C)
    attn = jax.nn.sigmoid(logits)                    # (B_TILE, C)

    # Single broadcast + scale over the whole (B_TILE, C, S) block.
    o_ref[...] = (attn[:, :, None] * xf).astype(o_ref.dtype)


def channel_attention_cbam(x, w1, w2, *, target_block_bytes=2 << 20):
    """x: (B, C, H, W); w1: (C//r, C); w2: (C, C//r) (torch Linear layout)."""
    B, C, H, W = x.shape
    S = H * W
    Cr = w1.shape[0]

    x_flat = x.reshape(B, C, S)                      # metadata-only reshape
    w1t = w1.T                                       # (C, Cr)
    w2t = w2.T                                       # (Cr, C)

    # Batch-group tile: ~target_block_bytes per block, dividing B exactly so
    # every grid step sees a full, deterministic block.
    itemsize = jnp.dtype(x.dtype).itemsize
    bytes_per_batch = C * S * itemsize
    b_tile = max(1, min(B, target_block_bytes // max(1, bytes_per_batch)))
    while B % b_tile:
        b_tile -= 1
    grid = (B // b_tile,)

    # Generation-aware VMEM headroom (v5e/v6e: 128 MiB phys, v7x: 64 MiB).
    try:
        vmem_cap = pltpu.get_tpu_info().vmem_capacity_bytes
    except Exception:
        vmem_cap = 64 << 20
    vmem_limit = int(min(vmem_cap * 7 // 8, 100 << 20))

    cost = pl.CostEstimate(
        flops=2 * B * C * S + 2 * (2 * B) * C * Cr * 2,   # reduce+scale + MLP
        transcendentals=B * C,                            # sigmoid
        bytes_accessed=2 * B * C * S * itemsize + 2 * C * Cr * 4,
    )

    out_flat = pl.pallas_call(
        functools.partial(_cbam_channel_attn_kernel, inv_s=1.0 / float(S)),
        out_shape=jax.ShapeDtypeStruct((B, C, S), x.dtype),
        grid=grid,
        in_specs=[
            pl.BlockSpec((b_tile, C, S), lambda b: (b, 0, 0)),  # batch group
            pl.BlockSpec((C, Cr), lambda b: (0, 0)),            # weights resident
            pl.BlockSpec((Cr, C), lambda b: (0, 0)),
        ],
        out_specs=pl.BlockSpec((b_tile, C, S), lambda b: (b, 0, 0)),
        compiler_params=pltpu.CompilerParams(
            dimension_semantics=("parallel",),   # shard batch groups across TCs
            vmem_limit_bytes=vmem_limit,
        ),
        cost_estimate=cost,
    )(x_flat, w1t, w2t)

    return out_flat.reshape(B, C, H, W)


def _reference(x, w1, w2):
    # Pure-JAX reference mirroring the PyTorch forward exactly.
    mx = jnp.max(x, axis=(2, 3))     # (B, C)
    av = jnp.mean(x, axis=(2, 3))    # (B, C)

    def mlp(p):
        return jnp.maximum(p @ w1.T, 0.0) @ w2.T

    attn = jax.nn.sigmoid(mlp(mx) + mlp(av))
    return attn[:, :, None, None] * x


if __name__ == "__main__":
    B, C, H, W = 2, 4, 16, 16
    ratio = 2
    Cr = C // ratio

    key = jax.random.PRNGKey(0)
    kx, k1, k2 = jax.random.split(key, 3)

    x = jax.random.normal(kx, (B, C, H, W), dtype=jnp.float32)
    # torch Linear layout: (out_features, in_features), bias=False
    w1 = jax.random.normal(k1, (Cr, C), dtype=jnp.float32) * 0.5
    w2 = jax.random.normal(k2, (C, Cr), dtype=jnp.float32) * 0.5

    out = channel_attention_cbam(x, w1, w2)
    out = jax.block_until_ready(out)

    ref = _reference(x, w1, w2)
    assert out.shape == (B, C, H, W)
    assert jnp.allclose(out, ref, atol=1e-5, rtol=1e-5), "mismatch vs reference"

    print("KERNEL_OK")
</pallas_src>

<mosaic_0001>
module attributes {stable_mosaic.version = 11 : i64} {
  func.func @_cbam_channel_attn_kernel(%arg0: i32, %arg1: memref<2x4x256xf32, #tpu.memory_space<vmem>>, %arg2: memref<4x2xf32, #tpu.memory_space<vmem>>, %arg3: memref<2x4xf32, #tpu.memory_space<vmem>>, %arg4: memref<2x4x256xf32, #tpu.memory_space<vmem>>) attributes {dimension_semantics = [#tpu.dimension_semantics<parallel>], iteration_bounds = array<i64: 1>, scalar_prefetch = 0 : i64, scratch_operands = 0 : i64, tpu.core_type = #tpu.core_type<tc>, window_params = [{transform_indices = @transform_0, window_bounds = array<i64: 2, 4, 256>}, {pipeline_mode = #tpu.pipeline_mode<synchronous>, transform_indices = @transform_1, window_bounds = array<i64: 4, 2>}, {pipeline_mode = #tpu.pipeline_mode<synchronous>, transform_indices = @transform_2, window_bounds = array<i64: 2, 4>}, {transform_indices = @transform_3, window_bounds = array<i64: 2, 4, 256>}]} {
    %c0 = arith.constant 0 : index
    %c0_0 = arith.constant 0 : index
    %c0_1 = arith.constant 0 : index
    %0 = vector.load %arg1[%c0, %c0_0, %c0_1] : memref<2x4x256xf32, #tpu.memory_space<vmem>>, vector<2x4x256xf32>
    %cst = arith.constant dense<0xFF800000> : vector<2x4xf32>
    %1 = vector.multi_reduction <maximumf>, %0, %cst [2] : vector<2x4x256xf32> to vector<2x4xf32>
    %cst_2 = arith.constant dense<0.000000e+00> : vector<2x4xf32>
    %2 = vector.multi_reduction <add>, %0, %cst_2 [2] : vector<2x4x256xf32> to vector<2x4xf32>
    %cst_3 = arith.constant 3.906250e-03 : f32
    %3 = vector.broadcast %cst_3 : f32 to vector<2x4xf32>
    %4 = arith.mulf %2, %3 : vector<2x4xf32>
    %5 = tpu.concatenate %1, %4 in 0 : vector<2x4xf32>, vector<2x4xf32> -> vector<4x4xf32>
    %c0_4 = arith.constant 0 : index
    %c0_5 = arith.constant 0 : index
    %6 = vector.load %arg2[%c0_4, %c0_5] : memref<4x2xf32, #tpu.memory_space<vmem>>, vector<4x2xf32>
    %cst_6 = arith.constant dense<0.000000e+00> : vector<4x2xf32>
    %7 = tpu.matmul %5, %6, %cst_6 {dimension_numbers = #tpu.dot_dimension_numbers<[1], [0], [0], [1], [0, 0, 1, 1], [], []>} : vector<4x4xf32>, vector<4x2xf32>, vector<4x2xf32> -> vector<4x2xf32>
    %cst_7 = arith.constant 0.000000e+00 : f32
    %8 = vector.broadcast %cst_7 : f32 to vector<4x2xf32>
    %9 = arith.maximumf %7, %8 : vector<4x2xf32>
    %c0_8 = arith.constant 0 : index
    %c0_9 = arith.constant 0 : index
    %10 = vector.load %arg3[%c0_8, %c0_9] : memref<2x4xf32, #tpu.memory_space<vmem>>, vector<2x4xf32>
    %cst_10 = arith.constant dense<0.000000e+00> : vector<4x4xf32>
    %11 = tpu.matmul %9, %10, %cst_10 {dimension_numbers = #tpu.dot_dimension_numbers<[1], [0], [0], [1], [0, 0, 1, 1], [], []>} : vector<4x2xf32>, vector<2x4xf32>, vector<4x4xf32> -> vector<4x4xf32>
    %12 = vector.extract_strided_slice %11 {offsets = [0, 0], sizes = [2, 4], strides = [1, 1]} : vector<4x4xf32> to vector<2x4xf32>
    %13 = vector.extract_strided_slice %11 {offsets = [2, 0], sizes = [2, 4], strides = [1, 1]} : vector<4x4xf32> to vector<2x4xf32>
    %14 = arith.addf %12, %13 : vector<2x4xf32>
    %15 = arith.negf %14 : vector<2x4xf32>
    %16 = math.exp %15 : vector<2x4xf32>
    %cst_11 = arith.constant 1.000000e+00 : f32
    %17 = vector.broadcast %cst_11 : f32 to vector<2x4xf32>
    %18 = arith.addf %17, %16 : vector<2x4xf32>
    %19 = arith.divf %17, %18 : vector<2x4xf32>
    %20 = vector.shape_cast %19 : vector<2x4xf32> to vector<2x4x1xf32>
    %21 = vector.broadcast %20 : vector<2x4x1xf32> to vector<2x4x256xf32>
    %22 = arith.mulf %21, %0 : vector<2x4x256xf32>
    %c0_12 = arith.constant 0 : index
    %c0_13 = arith.constant 0 : index
    %c0_14 = arith.constant 0 : index
    %23 = vector.load %arg4[%c0_12, %c0_13, %c0_14] : memref<2x4x256xf32, #tpu.memory_space<vmem>>, vector<2x4x256xf32>
    tpu.vector_store %arg4[%c0_12, %c0_13, %c0_14], %22 {strides = array<i32>} : memref<2x4x256xf32, #tpu.memory_space<vmem>>, vector<2x4x256xf32>,
    return
  }
  func.func @transform_0(%arg0: i32) -> (i32, i32, i32) {
    %c0_i32 = arith.constant 0 : i32
    %c0_i32_0 = arith.constant 0 : i32
    %c0_i32_1 = arith.constant 0 : i32
    return %arg0, %c0_i32, %c0_i32_0 : i32, i32, i32
  }
  func.func @transform_1(%arg0: i32) -> (i32, i32) {
    %c0_i32 = arith.constant 0 : i32
    %c0_i32_0 = arith.constant 0 : i32
    %c0_i32_1 = arith.constant 0 : i32
    return %c0_i32, %c0_i32_0 : i32, i32
  }
  func.func @transform_2(%arg0: i32) -> (i32, i32) {
    %c0_i32 = arith.constant 0 : i32
    %c0_i32_0 = arith.constant 0 : i32
    %c0_i32_1 = arith.constant 0 : i32
    return %c0_i32, %c0_i32_0 : i32, i32
  }
  func.func @transform_3(%arg0: i32) -> (i32, i32, i32) {
    %c0_i32 = arith.constant 0 : i32
    %c0_i32_0 = arith.constant 0 : i32
    %c0_i32_1 = arith.constant 0 : i32
    return %arg0, %c0_i32, %c0_i32_0 : i32, i32, i32
  }
}

</mosaic_0001>

<bundles_post_ra>
// kernel: tpu_custom_call.1
= control target key start
LH: loop header
LB: loop body
LE: loop exit
PB: predicated region body
PF: predicated region fallthrough
CT: control target
= control target key end

     0   :  { %8 = vsyncpa [#allocation3], 0  ;;  %s358_s0 = inlined_call_operand.hbm [shape: f32[2,4,256], index: 0, kind: input, shape index: {}]   ;;  %s359_s1 = inlined_call_operand.vmem [shape: f32[4,2], index: 1, kind: input, shape index: {}]   ;;  %s360_s2 = inlined_call_operand.vmem [shape: f32[2,4], index: 2, kind: input, shape index: {}]   ;;  %s361_s3 = inlined_call_operand.hbm [shape: f32[2,4,256], index: 3, kind: output, shape index: {}]  }
   0x1   :  { %9 = vsyncpa [#allocation4], 0  ;;  %s14_s14 = sshll.u32 %s358_s0, 4  ;;  %s305_s15 = smov [#allocation2]   ;;  %s15_s14 = int_to_ptr.hbm [resolvable:$true] %s14_s14 }
   0x2   :  { %s16_s16 = sshll.u32 %s305_s15, 4  ;;  %s306_s17 = smov 128   ;;  %s17_s16 = int_to_ptr.vmem [resolvable:$true] %s16_s16 }
   0x3   :  { %s307_s18 = smov 8  }
   0x4   :  { %22 = dma.hbm_to_vmem [thread:$0]  %s15_s14, 256, %s17_s16, [#allocation3], %s306_s17, %s306_s17, %s307_s18  }
   0x5   :  { %301 = dma.done.wait [#allocation3], 256  }
   0x6   :  { %302 = vsyncadd [#allocation3], 4294967040  ;;  %v31_v0 = vld [vmem:[#allocation2] sm:$0xff]  ;;  %v32_v1 = vld [vmem:[#allocation2 + $0x8] sm:$0xff]  ;;  %vm46_vm0 = vcmask 1043456   ;;  %v82_v25 = vlaneseq  ;;  %vm86_vm1 = vcmask 1041409  }
   0x7   :  { %35 = vst [vmem:[#allocation1] ss:$2 sm:$0xff] %v31_v0  ;;  %v98_v22 = vld [vmem:[%s359_s1] sm:$0xf]  ;;  %vm93_vm2 = vcmask 1043459   ;;  %vm96_vm3 = vcmask 1041408  }
   0x8   :  { %39 = vst [vmem:[#allocation1 + $0x10] ss:$2 sm:$0xff] %v32_v1  ;;  %238 = vmatpush.msk.msra.mxu0 %vm46_vm0, %v98_v22  ;;  %v83_v26 = vand.u32 127, %v82_v25  ;;  %vm99_vm4 = vcmask 31744   ;;  %v127_v38 = vld [vmem:[%s360_s2] sm:$0x3] }
   0x9   :  { %240 = vmatpush.msk.msra.mxu1 %vm96_vm3, %v127_v38  ;;  %vm128_vm5 = vcmask 15360   ;;  %v180_v41 = vshrl.u32 %v82_v25, 7  ;;  %s308_s2 = smov [#allocation5]   ;;  %s225_s24 = sshll.u32 %s361_s3, 4  ;;  %s226_s24 = int_to_ptr.hbm [resolvable:$true] %s225_s24 }
   0xa   :  { %s223_s21 = sshll.u32 %s308_s2, 4  ;;  %s224_s21 = int_to_ptr.vmem [resolvable:$true] %s223_s21 }
   0xb   :  { %247 = vset.pattern.permute.xlu2 %v180_v41  ;;  %248 = vset.pattern.permute.xlu0 %v180_v41 }
   0xe   :  { %v36_v2 = vld.sshfl [vmem:[#allocation1] sm:$0xff pattern:$0x75316420]  ;;  %v37_v3 = vld.sshfl [vmem:[#allocation1 + $0x8] sm:$0xff pattern:$0x75316420] }
   0xf   :  { %v47_v4 = vsel %vm46_vm0, %v36_v2, -inf  ;;  %v48_v5 = vsel %vm46_vm0, %v37_v3, -inf  ;;  %57 = vst [vmem:[#allocation1] ss:$2 sm:$0xff] %v31_v0 }
  0x10   :  { %v49_v6 = vmax.f32 %v47_v4, %v48_v5  ;;  %v40_v7 = vld.sshfl [vmem:[#allocation1 + $0x10] sm:$0xff pattern:$0x75316420]  ;;  %v41_v8 = vld.sshfl [vmem:[#allocation1 + $0x18] sm:$0xff pattern:$0x75316420] }
  0x11   :  { %61 = vst [vmem:[#allocation1 + $0x10] ss:$2 sm:$0xff] %v32_v1  ;;  %v52_v9 = vsel %vm46_vm0, %v40_v7, -inf  ;;  %v53_v10 = vsel %vm46_vm0, %v41_v8, -inf }
  0x12   :  { %50 = vmax.xlane.f32.xlu1 %v49_v6  ;;  %v54_v13 = vmax.f32 %v52_v9, %v53_v10 }
  0x16   :  { %v58_v11 = vld.sshfl [vmem:[#allocation1] sm:$0xff pattern:$0x75316420]  ;;  %v59_v12 = vld.sshfl [vmem:[#allocation1 + $0x8] sm:$0xff pattern:$0x75316420] }
  0x17   :  { %v68_v14 = vsel %vm46_vm0, %v58_v11, 0.0  ;;  %v69_v15 = vsel %vm46_vm0, %v59_v12, 0.0  ;;  %192 = vst [vmem:[#allocation1] ss:$2 sm:$0xff] %v31_v0 }
  0x18   :  { %v70_v16 = vadd.f32 %v69_v15, %v68_v14  ;;  %v62_v17 = vld.sshfl [vmem:[#allocation1 + $0x10] sm:$0xff pattern:$0x75316420]  ;;  %v63_v18 = vld.sshfl [vmem:[#allocation1 + $0x18] sm:$0xff pattern:$0x75316420] }
  0x19   :  { %196 = vst [vmem:[#allocation1 + $0x10] ss:$2 sm:$0xff] %v32_v1  ;;  %v73_v19 = vsel %vm46_vm0, %v62_v17, 0.0  ;;  %v74_v20 = vsel %vm46_vm0, %v63_v18, 0.0 }
  0x1a   :  { %71 = vadd.xlane.f32.xlu0 %v70_v16  ;;  %55 = vmax.xlane.f32.xlu1 %v54_v13  ;;  %v75_v21 = vadd.f32 %v74_v20, %v73_v19 }
  0x1e   :  { %v194_v60 = vld.sshfl [vmem:[#allocation1 + $0x8] sm:$0xff pattern:$0x75316420]  ;;  %v193_v61 = vld.sshfl [vmem:[#allocation1] sm:$0xff pattern:$0x75316420] }
  0x20   :  { %v198_v3 = vld.sshfl [vmem:[#allocation1 + $0x18] sm:$0xff pattern:$0x75316420]  ;;  %v197_v4 = vld.sshfl [vmem:[#allocation1 + $0x10] sm:$0xff pattern:$0x75316420] }
  0x22   :  { %76 = vadd.xlane.f32.xlu0 %v75_v21 }
  0x85   :  { %v51_v23 = vpop.xlane.xlu1 %50 }
  0x86   :  { %v84_v30 = vperm.slane %v51_v23, %v83_v26 }
  0x8d   :  { %v72_v24 = vpop.xlane.xlu0 %71  ;;  %v56_v27 = vpop.xlane.xlu1 %55 }
  0x8e   :  { %v78_v28 = vmul.f32 0.00390625, %v72_v24  ;;  %v85_v31 = vperm.slane %v56_v27, %v83_v26 }
  0x90   :  { %v91_v33 = vperm.slane %v78_v28, %v83_v26  ;;  %v87_v35 = vsel %vm86_vm1, %v85_v31, %v84_v30 }
  0x95   :  { %v77_v29 = vpop.xlane.xlu0 %76 }
  0x96   :  { %v79_v32 = vmul.f32 0.00390625, %v77_v29 }
  0x98   :  { %v92_v34 = vperm.slane %v79_v32, %v83_v26 }
  0x9a   :  { %v94_v36 = vsel %vm93_vm2, %v92_v34, %v91_v33 }
  0x9b   :  { %v97_v37 = vsel %vm96_vm3, %v87_v35, %v94_v36 }
  0x9c   :  { %239 = vmatmul.msk.f32.vlgmr.msra.gmra.mxu0 %vm99_vm4, %v97_v37 }
 0x119   :  { %v123_v39 = vpop.f32.mrf.mxu0 }
 0x11a   :  { %v126_v40 = vmax.f32 %v123_v39, 0.0 }
 0x11c   :  { %241 = vmatmul.msk.f32.vlgmr.msra.gmra.mxu1 %vm128_vm5, %v126_v40 }
 0x199   :  { %v152_v42 = vpop.f32.mrf.mxu1 }
 0x19a   :  { %v156_v43 = vrot.slane %v152_v42, 2 }
 0x19c   :  { %v158_v44 = vadd.f32 %v156_v43, %v152_v42 }
 0x19e   :  { %v242_v45 = vmul.f32 -1.442695, %v158_v44 }
 0x1a0   :  { %249 = vpow2.f32 %v242_v45 }
 0x1a6   :  { %v250_v46 = vpop.eup %249 }
 0x1a7   :  { %v162_v47 = vadd.f32 1.0, %v250_v46 }
 0x1a9   :  { %251 = vrcp.f32 %v162_v47  ;;  %v174_v51 = vand.u32 2147483648, %v162_v47  ;;  %v172_v53 = vand.u32 2147483647, %v162_v47  ;;  %vm168_vm7 = vweird.f32 %v162_v47 }
 0x1ab   :  { %v175_v55 = vor.u32 1.1754944e-38, %v174_v51  ;;  %vm173_vm9 = vcmp.eq.f32.partialorder %v172_v53, 8.507059e+37 }
 0x1af   :  { %v252_v48 = vpop.eup %251 }
 0x1b0   :  { %v164_v49 = vmul.f32 %v252_v48, %v162_v47  ;;  %vm169_vm6 = vweird.f32 %v252_v48 }
 0x1b1   :  { %vm170_vm8 = vmor %vm168_vm7, %vm169_vm6 }
 0x1b2   :  { %v165_v50 = vsub.f32 1.0, %v164_v49 }
 0x1b4   :  { %v166_v52 = vmul.f32 %v252_v48, %v165_v50 }
 0x1b6   :  { %v167_v54 = vadd.f32 %v252_v48, %v166_v52 }
 0x1b8   :  { %v171_v56 = vsel %vm170_vm8, %v252_v48, %v167_v54 }
 0x1b9   :  { %v176_v57 = vsel %vm173_vm9, %v175_v55, %v171_v56 }
 0x1ba   :  { %v178_v58 = vperm.slane %v176_v57, 0  ;;  %v185_v59 = vperm.slane %v176_v57, 1 }
 0x1bc   :  { %183 = vperm.xlu2 %247, %v178_v58  }
 0x1c4   :  { %190 = vperm.xlu2 %247, %v185_v59  }
 0x216   :  { %v184_v62 = vpop.permute.xlu2 %183 }
 0x217   :  { %v204_v63 = vmul.f32 %v194_v60, %v184_v62  ;;  %v203_v0 = vmul.f32 %v193_v61, %v184_v62 }
 0x219   :  { %v211_v1 = vrot.slane %v204_v63, 4 }
 0x21b   :  { %v213_v2 = vsel %vm46_vm0, %v203_v0, %v211_v1 }
 0x21c   :  { %217 = vst [vmem:[#allocation5] sm:$0xff] %v213_v2 }
 0x21e   :  { %v191_v5 = vpop.permute.xlu2 %190 }
 0x21f   :  { %v206_v6 = vmul.f32 %v198_v3, %v191_v5  ;;  %v205_v7 = vmul.f32 %v197_v4, %v191_v5 }
 0x221   :  { %v212_v8 = vrot.slane %v206_v6, 4 }
 0x223   :  { %v214_v9 = vsel %vm46_vm0, %v205_v7, %v212_v8 }
 0x224   :  { %218 = vst [vmem:[#allocation5 + $0x8] sm:$0xff] %v214_v9 }
 0x225   :  { %231 = dma.vmem_to_hbm [thread:$0]  %s224_s21, 256, %s226_s24, [#allocation4], %s306_s17, %s306_s17, %s307_s18  }
 0x226   :  { %303 = dma.done.wait [#allocation4], 256  }
 0x227   :  { %304 = vsyncadd [#allocation4], 4294967040 }
 0x228   :  { %236 = vsyncpa [#allocation3], 1 }
 0x229   :  { %237 = vsyncpa [#allocation4], 1 }

</bundles_post_ra>
